<compile_context>
chip_gen: v6e
topology: v6e:2x2x1
jax: 0.10.0
libtpu: 0.0.40
codegen_flags: <defaults>
</compile_context>

<pallas_src>
import numpy as np
import jax
import jax.numpy as jnp
from jax.experimental import pallas as pl
from jax.experimental.pallas import tpu as pltpu  # noqa: F401  (kept for TPU-specific tweaks)

# ----- small, self-consistent ModelArgs analogue -----
BATCH    = 2
SEQ      = 8            # seqlen == end_pos (start_pos = 0, empty cache)
DIM      = 32
N_HEADS  = 2
Q_LORA   = 16
KV_LORA  = 16
QK_NOPE  = 16
QK_ROPE  = 8
QK_HEAD  = QK_NOPE + QK_ROPE
V_HEAD   = 16
ROPE_THETA = 10000.0
SOFTMAX_SCALE = QK_HEAD ** (-0.5)   # max_seq_len == original_seq_len -> no mscale

QCAT = KV_LORA + QK_ROPE            # width of the fused per-head [abs | pe] block (24)
QW   = N_HEADS * QCAT               # width of the all-heads q block (48)
BS   = BATCH * SEQ                  # merged batch*seq rows (16)
NEG_INF = jnp.float32(-1e30)


# --------------------------- Pallas kernel ----------------------------------
def mla_kernel(
    x_ref,      # (BS, DIM)            flattened (batch, seq) tokens
    mask_ref,   # (BS, BS)             block-diagonal causal mask (0 / -1e30)
    trig_ref,   # (2, BS, QW)          [cos_pad; sin_pad], 1/0 on non-pe cols
    wqa_ref,    # (DIM, Q_LORA)        wq_a.T with DyT alpha folded in
    wqp_ref,    # (2, Q_LORA, QW)      [per-head [wqb_nope.T@wb1 | wqb_pe.T];
                #                       per-head [0 | wqb_pe.T@rot]]
    wkva_ref,   # (2, DIM, QCAT)       [wkv_a.T (kv cols alpha-scaled);
                #                       [0 | wkpe.T@rot]]
    wcv_ref,    # (N_HEADS*QCAT, DIM)  per-head [wb2.T @ wo_h ; zeros(pe rows)]
    prm_ref,    # (10, QW)             packed small biases / DyT gamma, beta / b_o
    out_ref,    # (BS, DIM)
):
    f32 = jnp.float32
    x = x_ref[...]
    mask = mask_ref[...]
    cos = trig_ref[0]                       # (BS, QW)
    sin = trig_ref[1]

    # ---- query low-rank + DyT (alpha already folded into wqa / bqa) ----
    qa = jnp.dot(x, wqa_ref[...], preferred_element_type=f32) + prm_ref[0:1, :Q_LORA]
    qn = prm_ref[1:2, :Q_LORA] * jnp.tanh(qa) + prm_ref[2:3, :Q_LORA]

    # ---- all heads at once: per-head block = [q_nope @ wb1 (absorbed) | q_pe] ----
    q_pre = jnp.dot(qn, wqp_ref[0], preferred_element_type=f32) + prm_ref[3:4, :]
    q_rot = jnp.dot(qn, wqp_ref[1], preferred_element_type=f32) + prm_ref[4:5, :]
    # RoPE applied only on pe columns (cos==1, sin==0 elsewhere)
    q_all = q_pre * cos + q_rot * sin       # (BS, QW)

    # ---- kv low-rank: cols [0:KV_LORA] -> DyT (kv_cache), cols [KV_LORA:] -> RoPE (pe_cache) ----
    kv_pre = jnp.dot(x, wkva_ref[0], preferred_element_type=f32) + prm_ref[5:6, :QCAT]
    kv_rot = jnp.dot(x, wkva_ref[1], preferred_element_type=f32) + prm_ref[6:7, :QCAT]
    dyt_v  = prm_ref[7:8, :QCAT] * jnp.tanh(kv_pre) + prm_ref[8:9, :QCAT]
    rope_v = kv_pre * cos[:, :QCAT] + kv_rot * sin[:, :QCAT]
    lane = jax.lax.broadcasted_iota(jnp.int32, (1, QCAT), 1)
    kvpe = jnp.where(lane < KV_LORA, dyt_v, rope_v)        # (BS, QCAT) = [kv_n | k_pe]

    # ---- attention per head, accumulating directly into the output projection ----
    acc = jnp.broadcast_to(prm_ref[9:10, :DIM], (BS, DIM))  # start from output bias
    for h in range(N_HEADS):                                 # static unroll
        q_h = q_all[:, h * QCAT:(h + 1) * QCAT]              # (BS, QCAT)
        s = jnp.dot(q_h, kvpe.T, preferred_element_type=f32) * SOFTMAX_SCALE + mask
        m = jnp.max(s, axis=-1, keepdims=True)
        e = jnp.exp(s - m)
        inv = pl.reciprocal(jnp.sum(e, axis=-1, keepdims=True), approx=True)
        probs = e * inv
        xc = jnp.dot(probs, kvpe, preferred_element_type=f32)        # (BS, QCAT); pe rows of wcv are 0
        acc = acc + jnp.dot(xc, wcv_ref[h * QCAT:(h + 1) * QCAT, :],
                            preferred_element_type=f32)

    out_ref[...] = acc.astype(out_ref.dtype)


# --------------------------- glue: fold weights & pack inputs ----------------
def _rot_matrix():
    rot = np.zeros((QK_ROPE, QK_ROPE), np.float32)   # interleaved pair rotation
    for i in range(0, QK_ROPE, 2):
        rot[i + 1, i] = -1.0
        rot[i, i + 1] = 1.0
    return jnp.asarray(rot)


def pack_inputs(x, p):
    B, S, D = x.shape
    f32 = jnp.float32
    rot = _rot_matrix()

    # RoPE tables (positions restart at 0 for every batch row; start_pos = 0)
    pos = jnp.arange(S, dtype=f32)
    inv = 1.0 / (ROPE_THETA ** (jnp.arange(0, QK_ROPE, 2, dtype=f32) / QK_ROPE))
    ang = pos[:, None] * inv[None, :]                          # (S, QK_ROPE//2)
    cos8 = jnp.tile(jnp.repeat(jnp.cos(ang), 2, axis=-1), (B, 1))   # (BS, QK_ROPE)
    sin8 = jnp.tile(jnp.repeat(jnp.sin(ang), 2, axis=-1), (B, 1))
    cos_blk = jnp.concatenate([jnp.ones((B * S, KV_LORA), f32), cos8], axis=-1)
    sin_blk = jnp.concatenate([jnp.zeros((B * S, KV_LORA), f32), sin8], axis=-1)
    trig = jnp.stack([jnp.tile(cos_blk, (1, N_HEADS)),
                      jnp.tile(sin_blk, (1, N_HEADS))], axis=0)      # (2, BS, QW)

    # block-diagonal causal mask over the merged batch*seq axis
    r = jnp.arange(B * S)
    same = (r[:, None] // S) == (r[None, :] // S)
    caus = (r[None, :] % S) <= (r[:, None] % S)
    mask2 = jnp.where(same & caus, jnp.float32(0.0), NEG_INF).astype(f32)

    # --- query path weights: fold DyT alpha into wq_a ---
    wqa_t = (p["q_alpha"] * p["wq_a"].T).astype(f32)           # (DIM, Q_LORA)
    bqa = (p["q_alpha"] * p["b_qa"]).astype(f32)

    wq_b_t = p["wq_b"].T                                       # (Q_LORA, N_HEADS*QK_HEAD)
    wkvb = p["wkv_b"].reshape(N_HEADS, QK_NOPE + V_HEAD, KV_LORA)
    wo_t = p["wo"].T                                           # (N_HEADS*V_HEAD, DIM)

    wq_big, wq_rotb, bq_big, bq_rot, wcv_blocks = [], [], [], [], []
    for h in range(N_HEADS):
        wnope = wq_b_t[:, h * QK_HEAD:h * QK_HEAD + QK_NOPE]   # (Q_LORA, QK_NOPE)
        wpe   = wq_b_t[:, h * QK_HEAD + QK_NOPE:(h + 1) * QK_HEAD]  # (Q_LORA, QK_ROPE)
        bnope = p["b_qb"][h * QK_HEAD:h * QK_HEAD + QK_NOPE]
        bpe   = p["b_qb"][h * QK_HEAD + QK_NOPE:(h + 1) * QK_HEAD]
        wb1 = wkvb[h, :QK_NOPE, :]                             # (QK_NOPE, KV_LORA)
        wb2 = wkvb[h, QK_NOPE:, :]                             # (V_HEAD, KV_LORA)
        wo_h = wo_t[h * V_HEAD:(h + 1) * V_HEAD, :]            # (V_HEAD, DIM)

        # absorbed query weight: q_abs = qn @ (wqb_nope.T @ wb1) + (bqb_nope @ wb1)
        wq_big.append(jnp.concatenate([wnope @ wb1, wpe], axis=1))          # (Q_LORA, QCAT)
        wq_rotb.append(jnp.concatenate([jnp.zeros((Q_LORA, KV_LORA), f32), wpe @ rot], axis=1))
        bq_big.append(jnp.concatenate([bnope @ wb1, bpe]))
        bq_rot.append(jnp.concatenate([jnp.zeros((KV_LORA,), f32), bpe @ rot]))
        # value+output projection folded: (KV_LORA, DIM), padded with zero pe rows
        wcv_blocks.append(jnp.concatenate([wb2.T @ wo_h,
                                           jnp.zeros((QK_ROPE, DIM), f32)], axis=0))

    wq_pack = jnp.stack([jnp.concatenate(wq_big, axis=1),
                         jnp.concatenate(wq_rotb, axis=1)], axis=0)          # (2, Q_LORA, QW)
    bq_big = jnp.concatenate(bq_big)                                         # (QW,)
    bq_rot = jnp.concatenate(bq_rot)
    wcv = jnp.concatenate(wcv_blocks, axis=0)                                # (N_HEADS*QCAT, DIM)

    # --- kv path weights: fold DyT alpha into the kv columns, fold rot for pe ---
    wkva_t = p["wkv_a"].T                                      # (DIM, QCAT)
    kv_scale = jnp.concatenate([jnp.full((KV_LORA,), p["kv_alpha"], f32),
                                jnp.ones((QK_ROPE,), f32)])
    wkva_scaled = wkva_t * kv_scale[None, :]
    bkva_scaled = p["b_kva"] * kv_scale
    wkva_rot = jnp.concatenate([jnp.zeros((DIM, KV_LORA), f32),
                                wkva_t[:, KV_LORA:] @ rot], axis=1)
    bkva_rot = jnp.concatenate([jnp.zeros((KV_LORA,), f32),
                                p["b_kva"][KV_LORA:] @ rot])
    wkva_pack = jnp.stack([wkva_scaled, wkva_rot], axis=0)     # (2, DIM, QCAT)

    # --- packed small params: one (10, QW) array, one DMA ---
    def row(v):
        v = jnp.asarray(v, f32).reshape(-1)
        return jnp.pad(v, (0, QW - v.shape[0]))

    params = jnp.stack([
        row(bqa),                                                    # 0  (:Q_LORA)
        row(p["q_gamma"]),                                           # 1
        row(p["q_beta"]),                                            # 2
        row(bq_big),                                                 # 3  (:QW)
        row(bq_rot),                                                 # 4
        row(bkva_scaled),                                            # 5  (:QCAT)
        row(bkva_rot),                                               # 6
        row(jnp.concatenate([p["kv_gamma"], jnp.ones((QK_ROPE,), f32)])),   # 7
        row(jnp.concatenate([p["kv_beta"], jnp.zeros((QK_ROPE,), f32)])),   # 8
        row(p["b_o"]),                                               # 9  (:DIM)
    ], axis=0)

    x2 = x.reshape(B * S, D).astype(f32)
    return x2, mask2, trig, wqa_t, wq_pack, wkva_pack, wcv, params


def mla_forward(x, p):
    B, S, D = x.shape
    args = pack_inputs(x, p)
    out2 = pl.pallas_call(
        mla_kernel,
        out_shape=jax.ShapeDtypeStruct((B * S, D), jnp.float32),
    )(*args)
    return out2.reshape(B, S, D)


# --------------------------- reference / test --------------------------------
def build_params(key):
    ks = jax.random.split(key, 14)

    def rnd(k, shape, scale=0.2):
        return scale * jax.random.normal(k, shape, dtype=jnp.float32)

    return {
        "wq_a":  rnd(ks[0], (Q_LORA, DIM)),
        "b_qa":  rnd(ks[1], (Q_LORA,), 0.05),
        "q_alpha": jnp.array(0.7, jnp.float32),          # DyT alpha
        "q_gamma": 1.0 + rnd(ks[2], (Q_LORA,), 0.05),    # DyT weight
        "q_beta":  rnd(ks[3], (Q_LORA,), 0.05),          # DyT bias
        "wq_b":  rnd(ks[4], (N_HEADS * QK_HEAD, Q_LORA)),
        "b_qb":  rnd(ks[5], (N_HEADS * QK_HEAD,), 0.05),
        "wkv_a": rnd(ks[6], (KV_LORA + QK_ROPE, DIM)),
        "b_kva": rnd(ks[7], (KV_LORA + QK_ROPE,), 0.05),
        "kv_alpha": jnp.array(0.6, jnp.float32),
        "kv_gamma": 1.0 + rnd(ks[8], (KV_LORA,), 0.05),
        "kv_beta":  rnd(ks[9], (KV_LORA,), 0.05),
        # NOTE: wkv_b bias exists in the module but is unused on the absorb path.
        "wkv_b": rnd(ks[10], (N_HEADS * (QK_NOPE + V_HEAD), KV_LORA)),
        "wo":    rnd(ks[11], (DIM, N_HEADS * V_HEAD)),
        "b_o":   rnd(ks[12], (DIM,), 0.05),
    }


def mla_reference(x, cos, sin, mask, p):
    """Pure-JAX reference mirroring the PyTorch absorb-path forward (unfused)."""
    B, S, _ = x.shape

    def dyt(v, a, g, b):
        return g * jnp.tanh(a * v) + b

    def rope_ref(v):
        shape = v.shape
        vr = v.reshape(shape[:-1] + (QK_ROPE // 2, 2))
        v0, v1 = vr[..., 0], vr[..., 1]
        if v.ndim == 4:
            c, s = cos[None, :, None, :], sin[None, :, None, :]
        else:
            c, s = cos[None, :, :], sin[None, :, :]
        return jnp.stack([v0 * c - v1 * s, v0 * s + v1 * c], axis=-1).reshape(shape)

    qa = x @ p["wq_a"].T + p["b_qa"]
    qn = dyt(qa, p["q_alpha"], p["q_gamma"], p["q_beta"])
    q = (qn @ p["wq_b"].T + p["b_qb"]).reshape(B, S, N_HEADS, QK_HEAD)
    q_nope, q_pe = q[..., :QK_NOPE], rope_ref(q[..., QK_NOPE:])

    kva = x @ p["wkv_a"].T + p["b_kva"]
    kv, k_pe = kva[..., :KV_LORA], rope_ref(kva[..., KV_LORA:])
    kv_n = dyt(kv, p["kv_alpha"], p["kv_gamma"], p["kv_beta"])

    wkvb = p["wkv_b"].reshape(N_HEADS, QK_NOPE + V_HEAD, KV_LORA)
    q_abs = jnp.einsum("bshd,hdc->bshc", q_nope, wkvb[:, :QK_NOPE])
    scores = (jnp.einsum("bshc,btc->bsht", q_abs, kv_n)
              + jnp.einsum("bshr,btr->bsht", q_pe, k_pe)) * SOFTMAX_SCALE
    scores = scores + mask[None, :, None, :]
    probs = jax.nn.softmax(scores.astype(jnp.float32), axis=-1)
    xc = jnp.einsum("bsht,btc->bshc", probs, kv_n)
    xv = jnp.einsum("bshc,hdc->bshd", xc, wkvb[:, -V_HEAD:])
    return xv.reshape(B, S, N_HEADS * V_HEAD) @ p["wo"].T + p["b_o"]


if __name__ == "__main__":
    key = jax.random.PRNGKey(0)
    kx, kp = jax.random.split(key)
    x = jax.random.normal(kx, (BATCH, SEQ, DIM), dtype=jnp.float32)
    params = build_params(kp)

    out = mla_forward(x, params)
    out = jax.block_until_ready(out)

    # reference uses un-duplicated cos/sin tables and a per-batch causal mask
    pos = jnp.arange(SEQ, dtype=jnp.float32)
    inv = 1.0 / (ROPE_THETA ** (jnp.arange(0, QK_ROPE, 2, dtype=jnp.float32) / QK_ROPE))
    ang = pos[:, None] * inv[None, :]
    cos, sin = jnp.cos(ang), jnp.sin(ang)
    mask = jnp.where(jnp.triu(jnp.ones((SEQ, SEQ), bool), k=1),
                     jnp.float32(-1e30), jnp.float32(0.0))
    ref = mla_reference(x, cos, sin, mask, params)

    assert out.shape == (BATCH, SEQ, DIM)
    max_err = float(jnp.max(jnp.abs(out - ref)))
    if not np.isfinite(max_err) or max_err > 5e-2:
        raise AssertionError(f"Pallas MLA mismatch vs reference, max abs err = {max_err}")
    print("KERNEL_OK")
</pallas_src>

<mosaic_0001>
module attributes {stable_mosaic.version = 11 : i64} {
  func.func @mla_kernel(%arg0: memref<16x32xf32, #tpu.memory_space<vmem>>, %arg1: memref<16x16xf32, #tpu.memory_space<vmem>>, %arg2: memref<2x16x48xf32, #tpu.memory_space<vmem>>, %arg3: memref<32x16xf32, #tpu.memory_space<vmem>>, %arg4: memref<2x16x48xf32, #tpu.memory_space<vmem>>, %arg5: memref<2x32x24xf32, #tpu.memory_space<vmem>>, %arg6: memref<48x32xf32, #tpu.memory_space<vmem>>, %arg7: memref<10x48xf32, #tpu.memory_space<vmem>>, %arg8: memref<16x32xf32, #tpu.memory_space<vmem>>) attributes {dimension_semantics = [], scalar_prefetch = 0 : i64, scratch_operands = 0 : i64, tpu.core_type = #tpu.core_type<tc>} {
    %c0 = arith.constant 0 : index
    %c0_0 = arith.constant 0 : index
    %0 = vector.load %arg0[%c0, %c0_0] : memref<16x32xf32, #tpu.memory_space<vmem>>, vector<16x32xf32>
    %c0_1 = arith.constant 0 : index
    %c0_2 = arith.constant 0 : index
    %1 = vector.load %arg1[%c0_1, %c0_2] : memref<16x16xf32, #tpu.memory_space<vmem>>, vector<16x16xf32>
    %c0_3 = arith.constant 0 : index
    %c0_4 = arith.constant 0 : index
    %c0_5 = arith.constant 0 : index
    %2 = vector.load %arg2[%c0_3, %c0_4, %c0_5] : memref<2x16x48xf32, #tpu.memory_space<vmem>>, vector<1x16x48xf32>
    %3 = vector.shape_cast %2 : vector<1x16x48xf32> to vector<16x48xf32>
    %c1 = arith.constant 1 : index
    %c0_6 = arith.constant 0 : index
    %c0_7 = arith.constant 0 : index
    %4 = vector.load %arg2[%c1, %c0_6, %c0_7] : memref<2x16x48xf32, #tpu.memory_space<vmem>>, vector<1x16x48xf32>
    %5 = vector.shape_cast %4 : vector<1x16x48xf32> to vector<16x48xf32>
    %c0_8 = arith.constant 0 : index
    %c0_9 = arith.constant 0 : index
    %6 = vector.load %arg3[%c0_8, %c0_9] : memref<32x16xf32, #tpu.memory_space<vmem>>, vector<32x16xf32>
    %cst = arith.constant dense<0.000000e+00> : vector<16x16xf32>
    %7 = tpu.matmul %0, %6, %cst {dimension_numbers = #tpu.dot_dimension_numbers<[1], [0], [0], [1], [0, 0, 1, 1], [], []>} : vector<16x32xf32>, vector<32x16xf32>, vector<16x16xf32> -> vector<16x16xf32>
    %c0_10 = arith.constant 0 : index
    %c0_11 = arith.constant 0 : index
    %8 = vector.load %arg7[%c0_10, %c0_11] : memref<10x48xf32, #tpu.memory_space<vmem>>, vector<1x16xf32>
    %9 = vector.broadcast %8 : vector<1x16xf32> to vector<16x16xf32>
    %10 = arith.addf %7, %9 : vector<16x16xf32>
    %c1_12 = arith.constant 1 : index
    %c0_13 = arith.constant 0 : index
    %11 = vector.load %arg7[%c1_12, %c0_13] : memref<10x48xf32, #tpu.memory_space<vmem>>, vector<1x16xf32>
    %12 = math.tanh %10 : vector<16x16xf32>
    %13 = vector.broadcast %11 : vector<1x16xf32> to vector<16x16xf32>
    %14 = arith.mulf %13, %12 : vector<16x16xf32>
    %c2 = arith.constant 2 : index
    %c0_14 = arith.constant 0 : index
    %15 = vector.load %arg7[%c2, %c0_14] : memref<10x48xf32, #tpu.memory_space<vmem>>, vector<1x16xf32>
    %16 = vector.broadcast %15 : vector<1x16xf32> to vector<16x16xf32>
    %17 = arith.addf %14, %16 : vector<16x16xf32>
    %c0_15 = arith.constant 0 : index
    %c0_16 = arith.constant 0 : index
    %c0_17 = arith.constant 0 : index
    %18 = vector.load %arg4[%c0_15, %c0_16, %c0_17] : memref<2x16x48xf32, #tpu.memory_space<vmem>>, vector<1x16x48xf32>
    %19 = vector.shape_cast %18 : vector<1x16x48xf32> to vector<16x48xf32>
    %cst_18 = arith.constant dense<0.000000e+00> : vector<16x48xf32>
    %20 = tpu.matmul %17, %19, %cst_18 {dimension_numbers = #tpu.dot_dimension_numbers<[1], [0], [0], [1], [0, 0, 1, 1], [], []>} : vector<16x16xf32>, vector<16x48xf32>, vector<16x48xf32> -> vector<16x48xf32>
    %c3 = arith.constant 3 : index
    %c0_19 = arith.constant 0 : index
    %21 = vector.load %arg7[%c3, %c0_19] : memref<10x48xf32, #tpu.memory_space<vmem>>, vector<1x48xf32>
    %22 = vector.broadcast %21 : vector<1x48xf32> to vector<16x48xf32>
    %23 = arith.addf %20, %22 : vector<16x48xf32>
    %c1_20 = arith.constant 1 : index
    %c0_21 = arith.constant 0 : index
    %c0_22 = arith.constant 0 : index
    %24 = vector.load %arg4[%c1_20, %c0_21, %c0_22] : memref<2x16x48xf32, #tpu.memory_space<vmem>>, vector<1x16x48xf32>
    %25 = vector.shape_cast %24 : vector<1x16x48xf32> to vector<16x48xf32>
    %cst_23 = arith.constant dense<0.000000e+00> : vector<16x48xf32>
    %26 = tpu.matmul %17, %25, %cst_23 {dimension_numbers = #tpu.dot_dimension_numbers<[1], [0], [0], [1], [0, 0, 1, 1], [], []>} : vector<16x16xf32>, vector<16x48xf32>, vector<16x48xf32> -> vector<16x48xf32>
    %c4 = arith.constant 4 : index
    %c0_24 = arith.constant 0 : index
    %27 = vector.load %arg7[%c4, %c0_24] : memref<10x48xf32, #tpu.memory_space<vmem>>, vector<1x48xf32>
    %28 = vector.broadcast %27 : vector<1x48xf32> to vector<16x48xf32>
    %29 = arith.addf %26, %28 : vector<16x48xf32>
    %30 = arith.mulf %23, %3 : vector<16x48xf32>
    %31 = arith.mulf %29, %5 : vector<16x48xf32>
    %32 = arith.addf %30, %31 : vector<16x48xf32>
    %c0_25 = arith.constant 0 : index
    %c0_26 = arith.constant 0 : index
    %c0_27 = arith.constant 0 : index
    %33 = vector.load %arg5[%c0_25, %c0_26, %c0_27] : memref<2x32x24xf32, #tpu.memory_space<vmem>>, vector<1x32x24xf32>
    %34 = vector.shape_cast %33 : vector<1x32x24xf32> to vector<32x24xf32>
    %cst_28 = arith.constant dense<0.000000e+00> : vector<16x24xf32>
    %35 = tpu.matmul %0, %34, %cst_28 {dimension_numbers = #tpu.dot_dimension_numbers<[1], [0], [0], [1], [0, 0, 1, 1], [], []>} : vector<16x32xf32>, vector<32x24xf32>, vector<16x24xf32> -> vector<16x24xf32>
    %c5 = arith.constant 5 : index
    %c0_29 = arith.constant 0 : index
    %36 = vector.load %arg7[%c5, %c0_29] : memref<10x48xf32, #tpu.memory_space<vmem>>, vector<1x24xf32>
    %37 = vector.broadcast %36 : vector<1x24xf32> to vector<16x24xf32>
    %38 = arith.addf %35, %37 : vector<16x24xf32>
    %c1_30 = arith.constant 1 : index
    %c0_31 = arith.constant 0 : index
    %c0_32 = arith.constant 0 : index
    %39 = vector.load %arg5[%c1_30, %c0_31, %c0_32] : memref<2x32x24xf32, #tpu.memory_space<vmem>>, vector<1x32x24xf32>
    %40 = vector.shape_cast %39 : vector<1x32x24xf32> to vector<32x24xf32>
    %cst_33 = arith.constant dense<0.000000e+00> : vector<16x24xf32>
    %41 = tpu.matmul %0, %40, %cst_33 {dimension_numbers = #tpu.dot_dimension_numbers<[1], [0], [0], [1], [0, 0, 1, 1], [], []>} : vector<16x32xf32>, vector<32x24xf32>, vector<16x24xf32> -> vector<16x24xf32>
    %c6 = arith.constant 6 : index
    %c0_34 = arith.constant 0 : index
    %42 = vector.load %arg7[%c6, %c0_34] : memref<10x48xf32, #tpu.memory_space<vmem>>, vector<1x24xf32>
    %43 = vector.broadcast %42 : vector<1x24xf32> to vector<16x24xf32>
    %44 = arith.addf %41, %43 : vector<16x24xf32>
    %c7 = arith.constant 7 : index
    %c0_35 = arith.constant 0 : index
    %45 = vector.load %arg7[%c7, %c0_35] : memref<10x48xf32, #tpu.memory_space<vmem>>, vector<1x24xf32>
    %46 = math.tanh %38 : vector<16x24xf32>
    %47 = vector.broadcast %45 : vector<1x24xf32> to vector<16x24xf32>
    %48 = arith.mulf %47, %46 : vector<16x24xf32>
    %c8 = arith.constant 8 : index
    %c0_36 = arith.constant 0 : index
    %49 = vector.load %arg7[%c8, %c0_36] : memref<10x48xf32, #tpu.memory_space<vmem>>, vector<1x24xf32>
    %50 = vector.broadcast %49 : vector<1x24xf32> to vector<16x24xf32>
    %51 = arith.addf %48, %50 : vector<16x24xf32>
    %52 = vector.extract_strided_slice %3 {offsets = [0, 0], sizes = [16, 24], strides = [1, 1]} : vector<16x48xf32> to vector<16x24xf32>
    %53 = arith.mulf %38, %52 : vector<16x24xf32>
    %54 = vector.extract_strided_slice %5 {offsets = [0, 0], sizes = [16, 24], strides = [1, 1]} : vector<16x48xf32> to vector<16x24xf32>
    %55 = arith.mulf %44, %54 : vector<16x24xf32>
    %56 = arith.addf %53, %55 : vector<16x24xf32>
    %57 = tpu.iota {dimensions = array<i32: 1>} : vector<1x24xi32>
    %c16_i32 = arith.constant 16 : i32
    %58 = vector.broadcast %c16_i32 : i32 to vector<1x24xi32>
    %59 = arith.cmpi slt, %57, %58 : vector<1x24xi32>
    %60 = vector.shape_cast %59 : vector<1x24xi1> to vector<1x24xi1>
    %61 = vector.broadcast %60 : vector<1x24xi1> to vector<16x24xi1>
    %62 = arith.select %61, %51, %56 : vector<16x24xi1>, vector<16x24xf32>
    %c9 = arith.constant 9 : index
    %c0_37 = arith.constant 0 : index
    %63 = vector.load %arg7[%c9, %c0_37] : memref<10x48xf32, #tpu.memory_space<vmem>>, vector<1x32xf32>
    %64 = vector.shape_cast %63 : vector<1x32xf32> to vector<1x32xf32>
    %65 = vector.broadcast %64 : vector<1x32xf32> to vector<16x32xf32>
    %66 = vector.extract_strided_slice %32 {offsets = [0, 0], sizes = [16, 24], strides = [1, 1]} : vector<16x48xf32> to vector<16x24xf32>
    %67 = tpu.transpose %62, [1, 0] : vector<16x24xf32> -> vector<24x16xf32>
    %cst_38 = arith.constant dense<0.000000e+00> : vector<16x16xf32>
    %68 = tpu.matmul %66, %67, %cst_38 {dimension_numbers = #tpu.dot_dimension_numbers<[1], [0], [0], [1], [0, 0, 1, 1], [], []>} : vector<16x24xf32>, vector<24x16xf32>, vector<16x16xf32> -> vector<16x16xf32>
    %cst_39 = arith.constant 0.204124153 : f32
    %69 = vector.broadcast %cst_39 : f32 to vector<16x16xf32>
    %70 = arith.mulf %68, %69 : vector<16x16xf32>
    %71 = arith.addf %70, %1 : vector<16x16xf32>
    %cst_40 = arith.constant dense<0xFF800000> : vector<16xf32>
    %72 = vector.multi_reduction <maximumf>, %71, %cst_40 [1] : vector<16x16xf32> to vector<16xf32>
    %73 = vector.shape_cast %72 : vector<16xf32> to vector<16x1xf32>
    %74 = vector.broadcast %73 : vector<16x1xf32> to vector<16x16xf32>
    %75 = arith.subf %71, %74 : vector<16x16xf32>
    %76 = math.exp %75 : vector<16x16xf32>
    %cst_41 = arith.constant dense<0.000000e+00> : vector<16xf32>
    %77 = vector.multi_reduction <add>, %76, %cst_41 [1] : vector<16x16xf32> to vector<16xf32>
    %78 = vector.shape_cast %77 : vector<16xf32> to vector<16x1xf32>
    %79 = tpu.reciprocal %78 {approx = true} : vector<16x1xf32> -> vector<16x1xf32>
    %80 = vector.broadcast %79 : vector<16x1xf32> to vector<16x16xf32>
    %81 = arith.mulf %76, %80 : vector<16x16xf32>
    %cst_42 = arith.constant dense<0.000000e+00> : vector<16x24xf32>
    %82 = tpu.matmul %81, %62, %cst_42 {dimension_numbers = #tpu.dot_dimension_numbers<[1], [0], [0], [1], [0, 0, 1, 1], [], []>} : vector<16x16xf32>, vector<16x24xf32>, vector<16x24xf32> -> vector<16x24xf32>
    %c0_43 = arith.constant 0 : index
    %c0_44 = arith.constant 0 : index
    %83 = vector.load %arg6[%c0_43, %c0_44] : memref<48x32xf32, #tpu.memory_space<vmem>>, vector<24x32xf32>
    %cst_45 = arith.constant dense<0.000000e+00> : vector<16x32xf32>
    %84 = tpu.matmul %82, %83, %cst_45 {dimension_numbers = #tpu.dot_dimension_numbers<[1], [0], [0], [1], [0, 0, 1, 1], [], []>} : vector<16x24xf32>, vector<24x32xf32>, vector<16x32xf32> -> vector<16x32xf32>
    %85 = arith.addf %65, %84 : vector<16x32xf32>
    %86 = vector.extract_strided_slice %32 {offsets = [0, 24], sizes = [16, 24], strides = [1, 1]} : vector<16x48xf32> to vector<16x24xf32>
    %87 = tpu.transpose %62, [1, 0] : vector<16x24xf32> -> vector<24x16xf32>
    %cst_46 = arith.constant dense<0.000000e+00> : vector<16x16xf32>
    %88 = tpu.matmul %86, %87, %cst_46 {dimension_numbers = #tpu.dot_dimension_numbers<[1], [0], [0], [1], [0, 0, 1, 1], [], []>} : vector<16x24xf32>, vector<24x16xf32>, vector<16x16xf32> -> vector<16x16xf32>
    %cst_47 = arith.constant 0.204124153 : f32
    %89 = vector.broadcast %cst_47 : f32 to vector<16x16xf32>
    %90 = arith.mulf %88, %89 : vector<16x16xf32>
    %91 = arith.addf %90, %1 : vector<16x16xf32>
    %cst_48 = arith.constant dense<0xFF800000> : vector<16xf32>
    %92 = vector.multi_reduction <maximumf>, %91, %cst_48 [1] : vector<16x16xf32> to vector<16xf32>
    %93 = vector.shape_cast %92 : vector<16xf32> to vector<16x1xf32>
    %94 = vector.broadcast %93 : vector<16x1xf32> to vector<16x16xf32>
    %95 = arith.subf %91, %94 : vector<16x16xf32>
    %96 = math.exp %95 : vector<16x16xf32>
    %cst_49 = arith.constant dense<0.000000e+00> : vector<16xf32>
    %97 = vector.multi_reduction <add>, %96, %cst_49 [1] : vector<16x16xf32> to vector<16xf32>
    %98 = vector.shape_cast %97 : vector<16xf32> to vector<16x1xf32>
    %99 = tpu.reciprocal %98 {approx = true} : vector<16x1xf32> -> vector<16x1xf32>
    %100 = vector.broadcast %99 : vector<16x1xf32> to vector<16x16xf32>
    %101 = arith.mulf %96, %100 : vector<16x16xf32>
    %cst_50 = arith.constant dense<0.000000e+00> : vector<16x24xf32>
    %102 = tpu.matmul %101, %62, %cst_50 {dimension_numbers = #tpu.dot_dimension_numbers<[1], [0], [0], [1], [0, 0, 1, 1], [], []>} : vector<16x16xf32>, vector<16x24xf32>, vector<16x24xf32> -> vector<16x24xf32>
    %c24 = arith.constant 24 : index
    %c0_51 = arith.constant 0 : index
    %103 = vector.load %arg6[%c24, %c0_51] : memref<48x32xf32, #tpu.memory_space<vmem>>, vector<24x32xf32>
    %cst_52 = arith.constant dense<0.000000e+00> : vector<16x32xf32>
    %104 = tpu.matmul %102, %103, %cst_52 {dimension_numbers = #tpu.dot_dimension_numbers<[1], [0], [0], [1], [0, 0, 1, 1], [], []>} : vector<16x24xf32>, vector<24x32xf32>, vector<16x32xf32> -> vector<16x32xf32>
    %105 = arith.addf %85, %104 : vector<16x32xf32>
    %c0_53 = arith.constant 0 : index
    %c0_54 = arith.constant 0 : index
    %106 = vector.load %arg8[%c0_53, %c0_54] : memref<16x32xf32, #tpu.memory_space<vmem>>, vector<16x32xf32>
    tpu.vector_store %arg8[%c0_53, %c0_54], %105 {strides = array<i32>} : memref<16x32xf32, #tpu.memory_space<vmem>>, vector<16x32xf32>,
    return
  }
}

</mosaic_0001>

<bundles_post_ra>
// kernel: tpu_custom_call.1
= control target key start
LH: loop header
LB: loop body
LE: loop exit
PB: predicated region body
PF: predicated region fallthrough
CT: control target
= control target key end

     0   :  { %vm48_vm0 = vcmask 261120   ;;  %s1583_s0 = inlined_call_operand.vmem [shape: f32[16,32], index: 0, kind: input, shape index: {}]   ;;  %s1584_s1 = inlined_call_operand.vmem [shape: f32[16,16], index: 1, kind: input, shape index: {}]   ;;  %s1585_s2 = inlined_call_operand.vmem [shape: f32[2,16,48], index: 2, kind: input, shape index: {}]   ;;  %s1586_s3 = inlined_call_operand.vmem [shape: f32[32,16], index: 3, kind: input, shape index: {}]   ;;  %s1587_s4 = inlined_call_operand.vmem [shape: f32[2,16,48], index: 4, kind: input, shape index: {}]   ;;  %s1588_s5 = inlined_call_operand.vmem [shape: f32[2,32,24], index: 5, kind: input, shape index: {}]   ;;  %s1589_s6 = inlined_call_operand.vmem [shape: f32[48,32], index: 6, kind: input, shape index: {}]   ;;  %s1590_s7 = inlined_call_operand.vmem [shape: f32[10,48], index: 7, kind: input, shape index: {}]   ;;  %s1591_s8 = inlined_call_operand.hbm [shape: f32[16,32], index: 8, kind: output, shape index: {}]  }
   0x1   :  { %v42_v0 = vld [vmem:[%s1586_s3 + $0x18] sm:$0xff]  ;;  %v41_v1 = vld [vmem:[%s1586_s3 + $0x10] sm:$0xff]  ;;  %v1399_v2 = vld [vmem:[%s1583_s0] sm:$0xff] }
   0x2   :  { %1198 = vmatprep.subr.mxu0 %v42_v0  ;;  %v40_v3 = vld [vmem:[%s1586_s3 + $0x8] sm:$0xff]  ;;  %1206 = vmatprep.mubr.msk.f32.mxu0 %vm48_vm0, %v1399_v2 }
   0x3   :  { %1199 = vmatpush3.msra.mxu0 %v42_v0 }
   0x4   :  { %13 = vsyncpa [#allocation3], 0  ;;  %1200 = vmatprep.subr.mxu0 %v41_v1  ;;  %v39_v4 = vld [vmem:[%s1586_s3] sm:$0xff]  ;;  %v1412_v5 = vld [vmem:[%s1583_s0 + $0x8] sm:$0xff]  ;;  %vm153_vm1 = vcmask 130048   ;;  %v515_v50 = vlaneseq  ;;  %vm527_vm2 = vcmask 195584  }
   0x5   :  { %1201 = vmatpush3.msra.mxu0 %v41_v1  ;;  %v327_v6 = vld [vmem:[%s1588_s5 + $0x18] sm:$0xff]  ;;  %v326_v7 = vld [vmem:[%s1588_s5 + $0x10] sm:$0xff]  ;;  %v147_v8 = vld [vmem:[%s1587_s4 + $0x8] sm:$0xff]  ;;  %s1341_s17 = smov 104   ;;  %s1342_s30 = smov [#allocation2]  }
   0x6   :  { %1202 = vmatprep.subr.mxu0 %v40_v3  ;;  %v146_v9 = vld [vmem:[%s1587_s4] sm:$0xff]  ;;  %v325_v10 = vld [vmem:[%s1588_s5 + $0x8] sm:$0xff]  ;;  %1209 = vmatprep.subr.mxu1 %v147_v8  ;;  %v1113_v12 = vld [vmem:[%s1587_s4 + $0x18] sm:$0xff]  ;;  %v516_v62 = vand.u32 127, %v515_v50  ;;  %s1091_s9 = sshll.u32 %s1342_s30, 4  ;;  %s1092_s9 = int_to_ptr.vmem [resolvable:$true] %s1091_s9 }
   0x7   :  { %1203 = vmatpush3.msra.mxu0 %v40_v3  ;;  %1210 = vmatpush3.msra.mxu1 %v147_v8  ;;  %v324_v11 = vld [vmem:[%s1588_s5] sm:$0xff]  ;;  %v1112_v26 = vld [vmem:[%s1587_s4 + $0x10] sm:$0xff]  ;;  %v1123_v27 = vld [vmem:[%s1588_s5 + $0x38] sm:$0xff]  ;;  %p1324_p1 = scmp.lt.s32.totalorder %s1092_s9, %s1092_s9 }
   0x8   :  { %1204 = vmatprep.subr.mxu0 %v39_v4  ;;  %1211 = vmatprep.subr.mxu1 %v146_v9  ;;  %v1104_v13 = vld [vmem:[%s1590_s7] ss:$0 sm:$0xff]  ;;  %v1107_v18 = vld [vmem:[%s1590_s7 + $0x1] ss:$0 sm:$0xff]  ;;  %v1108_v23 = vld [vmem:[%s1590_s7 + $0x2] ss:$0 sm:$0xff] }
   0x9   :  { %1205 = vmatpush3.msra.mxu0 %v39_v4  ;;  %1212 = vmatpush3.msra.mxu1 %v146_v9  ;;  %v1122_v28 = vld [vmem:[%s1588_s5 + $0x30] sm:$0xff]  ;;  %v1121_v29 = vld [vmem:[%s1588_s5 + $0x28] sm:$0xff]  ;;  %v1120_v30 = vld [vmem:[%s1588_s5 + $0x20] sm:$0xff]  ;;  %vm517_vm3 = vcmp.lt.s32.totalorder %v516_v62, 16 }
   0xa   :  { %1207 = vmatmul.mubr.msk.f32.vlgmr.msra.gmra.mxu0 %vm48_vm0, %v1412_v5  ;;  %1223 = vmatprep.subr.mxu0 %v327_v6  ;;  %v1117_v32 = vld [vmem:[%s1590_s7 + $0x5] ss:$0 sm:$0xff]  ;;  %v1109_v38 = vld [vmem:[%s1590_s7 + $0x3] ss:$0 sm:$0xff]  ;;  %v1114_v40 = vld [vmem:[%s1590_s7 + $0x4] ss:$0 sm:$0xff] }
   0xb   :  { %1231 = vmatprep.mubr.msk.f32.mxu0 %vm48_vm0, %v1399_v2  ;;  %1224 = vmatpush3.msra.mxu0 %v327_v6  ;;  %v1102_v42 = vld [vmem:[%s1585_s2 + $0x10] sm:$0xff]  ;;  %v34_v47 = vld [vmem:[%s1585_s2] sm:$0xff]  ;;  %v1103_v48 = vld [vmem:[%s1585_s2 + $0x18] sm:$0xff] }
   0xc   :  { %1225 = vmatprep.subr.mxu0 %v326_v7  ;;  %1216 = vmatprep.subr.mxu1 %v1113_v12  ;;  %v1127_v49 = vld [vmem:[%s1590_s7 + $0x7] ss:$0 sm:$0xff]  ;;  %v1124_v54 = vld [vmem:[%s1590_s7 + $0x6] ss:$0 sm:$0xff]  ;;  %v35_v56 = vld [vmem:[%s1585_s2 + $0x8] sm:$0xff] }
   0xd   :  { %1226 = vmatpush3.msra.mxu0 %v326_v7  ;;  %v1128_v61 = vld [vmem:[%s1590_s7 + $0x8] ss:$0 sm:$0xff] }
   0xe   :  { %1227 = vmatprep.subr.mxu0 %v325_v10 }
   0xf   :  { %1228 = vmatpush3.msra.mxu0 %v325_v10 }
  0x10   :  { %1229 = vmatprep.subr.mxu0 %v324_v11 }
  0x11   :  { %1230 = vmatpush3.msra.mxu0 %v324_v11 }
  0x12   :  { %1232 = vmatmul.mubr.msk.f32.vlgmr.msra.gmra.mxu0 %vm48_vm0, %v1412_v5 }
  0xca   :  { %v1208_v14 = vpop.f32.mrf.mxu0 }
  0xcb   :  { %v127_v15 = vadd.f32 %v1208_v14, %v1104_v13 }
  0xcc   :  { %v121_v16 = vpop.f32.mrf.mxu0 }
  0xcd   :  { %1295 = vtanh.f32 %v127_v15  ;;  %v122_v17 = vadd.f32 %v1104_v13, %v121_v16 }
  0xcf   :  { %1297 = vtanh.f32 %v122_v17 }
  0xd2   :  { %v1233_v31 = vpop.f32.mrf.mxu0 }
  0xd3   :  { %v405_v33 = vadd.f32 %v1233_v31, %v1117_v32 }
  0xd4   :  { %v399_v34 = vpop.f32.mrf.mxu0 }
  0xd5   :  { %v400_v35 = vadd.f32 %v1117_v32, %v399_v34  ;;  %1299 = vtanh.f32 %v405_v33  ;;  %v510_v1 = vmul.f32 %v405_v33, %v35_v56 }
  0xd7   :  { %1301 = vtanh.f32 %v400_v35  ;;  %v509_v8 = vmul.f32 %v400_v35, %v34_v47 }
  0xda   :  { %v1296_v19 = vpop.eup %1295 }
  0xdb   :  { %v138_v21 = vmul.f32 %v1296_v19, %v1107_v18  ;;  %v32_v19 = vld [vmem:[%s1584_s1] sm:$0xff] }
  0xdc   :  { %v1298_v20 = vpop.eup %1297 }
  0xdd   :  { %v137_v22 = vmul.f32 %v1298_v20, %v1107_v18  ;;  %v145_v25 = vadd.f32 %v1108_v23, %v138_v21 }
  0xdf   :  { %v144_v24 = vadd.f32 %v1108_v23, %v137_v22  ;;  %v33_v22 = vld [vmem:[%s1584_s1 + $0x8] sm:$0xff] }
  0xe1   :  { %1213 = vmatprep.mubr.msk.f32.mxu1 %vm153_vm1, %v144_v24 }
  0xe2   :  { %1214 = vmatmul.mubr.msk.f32.vlgmr.msra.gmra.mxu1 %vm153_vm1, %v145_v25  ;;  %v1300_v46 = vpop.eup %1299 }
  0xe3   :  { %1217 = vmatpush3.msra.mxu1 %v1113_v12  ;;  %1220 = vmatprep.mubr.msk.f32.mxu1 %vm153_vm1, %v144_v24  ;;  %v501_v58 = vmul.f32 %v1300_v46, %v1127_v49 }
  0xe4   :  { %1218 = vmatprep.subr.mxu1 %v1112_v26  ;;  %v1302_v55 = vpop.eup %1301 }
  0xe5   :  { %1219 = vmatpush3.msra.mxu1 %v1112_v26  ;;  %v500_v3 = vmul.f32 %v1302_v55, %v1127_v49  ;;  %v508_v4 = vadd.f32 %v1128_v61, %v501_v58  ;;  %v723_v58 = vld [vmem:[%s1589_s6 + $0x8] sm:$0xff] }
  0xe6   :  { %1234 = vmatprep.subr.mxu1 %v1123_v27  ;;  %1221 = vmatmul.mubr.msk.f32.vlgmr.msra.gmra.mxu1 %vm153_vm1, %v145_v25 }
  0xe7   :  { %1235 = vmatpush3.msra.mxu1 %v1123_v27  ;;  %1242 = vmatprep.mubr.msk.f32.mxu1 %vm48_vm0, %v1399_v2  ;;  %v507_v12 = vadd.f32 %v1128_v61, %v500_v3 }
  0xe8   :  { %1236 = vmatprep.subr.mxu1 %v1122_v28 }
  0xe9   :  { %1237 = vmatpush3.msra.mxu1 %v1122_v28 }
  0xea   :  { %1238 = vmatprep.subr.mxu1 %v1121_v29 }
  0xeb   :  { %1239 = vmatpush3.msra.mxu1 %v1121_v29 }
  0xec   :  { %1240 = vmatprep.subr.mxu1 %v1120_v30 }
  0xed   :  { %1241 = vmatpush3.msra.mxu1 %v1120_v30 }
  0xee   :  { %1243 = vmatmul.mubr.msk.f32.vlgmr.msra.gmra.mxu1 %vm48_vm0, %v1412_v5 }
 0x1a2   :  { %v1215_v36 = vpop.f32.mrf.mxu1 }
 0x1a3   :  { %v232_v51 = vadd.f32 %v1215_v36, %v1109_v38 }
 0x1a4   :  { %v226_v37 = vpop.f32.mrf.mxu1 }
 0x1a5   :  { %v227_v41 = vadd.f32 %v1109_v38, %v226_v37  ;;  %v319_v63 = vmul.f32 %v232_v51, %v35_v56 }
 0x1a6   :  { %v1222_v39 = vpop.f32.mrf.mxu1 }
 0x1a7   :  { %v315_v44 = vadd.f32 %v1222_v39, %v1114_v40  ;;  %v318_v52 = vmul.f32 %v227_v41, %v34_v47 }
 0x1a8   :  { %v309_v43 = vpop.f32.mrf.mxu1 }
 0x1a9   :  { %v310_v45 = vadd.f32 %v1114_v40, %v309_v43  ;;  %v321_v57 = vmul.f32 %v1103_v48, %v315_v44 }
 0x1ab   :  { %v320_v53 = vmul.f32 %v1102_v42, %v310_v45  ;;  %v323_v7 = vadd.f32 %v321_v57, %v319_v63  ;;  %v724_v45 = vld [vmem:[%s1589_s6 + $0x10] sm:$0xff] }
 0x1ad   :  { %v322_v59 = vadd.f32 %v320_v53, %v318_v52 }
 0x1ae   :  { %v1244_v60 = vpop.f32.mrf.mxu1 }
 0x1af   :  { %v490_v0 = vadd.f32 %v1244_v60, %v1124_v54  ;;  %808 = vrot.lane.b32.xlu0 %v322_v59, %s1341_s17  ;;  %1249 = vmatprep.mubr.msk.f32.mxu0 %vm527_vm2, %v322_v59  ;;  %v722_v59 = vld [vmem:[%s1589_s6] sm:$0xff] }
 0x1b0   :  { %v484_v2 = vpop.f32.mrf.mxu1 }
 0x1b1   :  { %v512_v5 = vmul.f32 %v1103_v48, %v490_v0  ;;  %v485_v6 = vadd.f32 %v1124_v54, %v484_v2 }
 0x1b3   :  { %v514_v9 = vadd.f32 %v512_v5, %v510_v1  ;;  %v511_v10 = vmul.f32 %v1102_v42, %v485_v6  ;;  %810 = vrot.lane.b32.xlu0 %v323_v7, %s1341_s17 }
 0x1b5   :  { %v1504_v11 = vsel %vm517_vm3, %v508_v4, %v514_v9  ;;  %v513_v13 = vadd.f32 %v511_v10, %v509_v8  ;;  %v1000_v8 = vld [vmem:[%s1589_s6 + $0x28] sm:$0xff]  ;;  %v999_v9 = vld [vmem:[%s1589_s6 + $0x20] sm:$0xff]  ;;  %v998_v10 = vld [vmem:[%s1589_s6 + $0x18] sm:$0xff]  ;;  %s1319_s6 = scalar_lea.vmem %s1092_s9, 256 }
 0x1b6   :  { %1245 = vmatprep.subr.msk.mxu0 %vm527_vm2, %v1504_v11  ;;  %1252 = vmatprep.subr.mxu1 %v1504_v11  ;;  %p1320_p0 = scmp.ne.s32.totalorder %s1092_s9, %s1319_s6  ;;  %p1325_p2 = scmp.lt.s32.totalorder %s1319_s6, %s1319_s6 }
 0x1b7   :  { %v1509_v14 = vsel %vm517_vm3, %v507_v12, %v513_v13  ;;  %1246 = vmatpush3.xpose.msk.msra.mxu0 %vm527_vm2, %v1504_v11  ;;  %1253 = vmatpush3.msra.mxu1 %v1504_v11 }
 0x1b8   :  { %1247 = vmatprep.subr.msk.mxu0 %vm527_vm2, %v1509_v14  ;;  %1254 = vmatprep.subr.mxu1 %v1509_v14  ;;  %p1326_p3 = por %p1325_p2, %p1324_p1 }
 0x1b9   :  { %1255 = vmatpush3.msra.mxu1 %v1509_v14 }
 0x1ba   :  { %1259 = vmatprep.subr.mxu1 %v724_v45  ;;  %p1327_p4 = pnand %p1326_p3, %p1320_p0 }
 0x1bb   :  { %1248 = vmatpush3.xpose.msk.msra.mxu0 %vm527_vm2, %v1509_v14 }
 0x1bc   :  { %1268 = vmatprep.subr.msk.mxu0 %vm527_vm2, %v1504_v11 }
 0x1be   :  { %1250 = vmatmul.mubr.msk.f32.vlgmr.msra.gmra.mxu0 %vm527_vm2, %v323_v7 }
 0x1bf   :  { %1269 = vmatpush3.xpose.msk.msra.mxu0 %vm527_vm2, %v1504_v11 }
 0x1c0   :  { %1270 = vmatprep.subr.msk.mxu0 %vm527_vm2, %v1509_v14 }
 0x1c3   :  { %1271 = vmatpush3.xpose.msk.msra.mxu0 %vm527_vm2, %v1509_v14 }
 0x221   :  { %v809_v15 = vpop.permute.xlu0 %808 }
 0x222   :  { %1272 = vmatprep.mubr.msk.f32.mxu0 %vm527_vm2, %v809_v15  ;;  %v1129_v15 = vld [vmem:[%s1590_s7 + $0x9] ss:$0 sm:$0xff] }
 0x225   :  { %v811_v16 = vpop.permute.xlu0 %810 }
 0x226   :  { %1273 = vmatmul.mubr.msk.f32.vlgmr.msra.gmra.mxu0 %vm527_vm2, %v811_v16 }
 0x27e   :  { %v1251_v17 = vpop.f32.mrf.mxu0 }
 0x27f   :  { %v616_v20 = vmul.f32 0.20412415, %v1251_v17 }
 0x280   :  { %v606_v18 = vpop.f32.mrf.mxu0 }
 0x281   :  { %v615_v21 = vmul.f32 0.20412415, %v606_v18  ;;  %v618_v25 = vadd.f32 %v616_v20, %v33_v22 }
 0x283   :  { %v617_v23 = vadd.f32 %v615_v21, %v32_v19  ;;  %v622_v26 = vsel %vm153_vm1, %v618_v25, -inf }
 0x285   :  { %v619_v24 = vsel %vm153_vm1, %v617_v23, -inf }
 0x286   :  { %620 = vmax.xlane.f32.xlu1 %v619_v24 }
 0x28a   :  { %623 = vmax.xlane.f32.xlu1 %v622_v26 }
 0x2e6   :  { %v1274_v33 = vpop.f32.mrf.mxu0 }
 0x2e7   :  { %v892_v39 = vmul.f32 0.20412415, %v1274_v33 }
 0x2e8   :  { %v882_v34 = vpop.f32.mrf.mxu0 }
 0x2e9   :  { %v891_v36 = vmul.f32 0.20412415, %v882_v34  ;;  %v894_v43 = vadd.f32 %v892_v39, %v33_v22 }
 0x2eb   :  { %v893_v40 = vadd.f32 %v891_v36, %v32_v19  ;;  %v898_v44 = vsel %vm153_vm1, %v894_v43, -inf }
 0x2ed   :  { %v895_v42 = vsel %vm153_vm1, %v893_v40, -inf }
 0x30f   :  { %v621_v27 = vpop.xlane.xlu1 %620 }
 0x310   :  { %v625_v28 = vsub.f32 %v617_v23, %v621_v27 }
 0x312   :  { %v627_v29 = vmul.f32 1.442695, %v625_v28 }
 0x313   :  { %v624_v30 = vpop.xlane.xlu1 %623 }
 0x314   :  { %1303 = vpow2.f32 %v627_v29  ;;  %v626_v31 = vsub.f32 %v618_v25, %v624_v30 }
 0x316   :  { %v629_v32 = vmul.f32 1.442695, %v626_v31 }
 0x318   :  { %1305 = vpow2.f32 %v629_v32 }
 0x321   :  { %v1304_v35 = vpop.eup %1303 }
 0x322   :  { %v631_v37 = vsel %vm153_vm1, %v1304_v35, 0.0 }
 0x323   :  { %632 = vadd.xlane.f32.xlu0 %v631_v37 }
 0x325   :  { %v1306_v38 = vpop.eup %1305 }
 0x326   :  { %v634_v41 = vsel %vm153_vm1, %v1306_v38, 0.0 }
 0x327   :  { %635 = vadd.xlane.f32.xlu1 %v634_v41 }
 0x32b   :  { %896 = vmax.xlane.f32.xlu1 %v895_v42 }
 0x32f   :  { %899 = vmax.xlane.f32.xlu1 %v898_v44 }
 0x3ac   :  { %v633_v46 = vpop.xlane.xlu0 %632 }
 0x3ad   :  { %1307 = vrcp.f32 %v633_v46 }
 0x3b0   :  { %v636_v47 = vpop.xlane.xlu1 %635 }
 0x3b1   :  { %1309 = vrcp.f32 %v636_v47 }
 0x3b4   :  { %v897_v48 = vpop.xlane.xlu1 %896 }
 0x3b5   :  { %v901_v49 = vsub.f32 %v893_v40, %v897_v48 }
 0x3b7   :  { %v903_v50 = vmul.f32 1.442695, %v901_v49 }
 0x3b8   :  { %v900_v51 = vpop.xlane.xlu1 %899 }
 0x3b9   :  { %1311 = vpow2.f32 %v903_v50  ;;  %v902_v52 = vsub.f32 %v894_v43, %v900_v51 }
 0x3ba   :  { %v1308_v53 = vpop.eup %1307 }
 0x3bb   :  { %v905_v54 = vmul.f32 1.442695, %v902_v52  ;;  %v639_v55 = vmul.f32 %v1308_v53, %v1304_v35 }
 0x3bd   :  { %1313 = vpow2.f32 %v905_v54  ;;  %1256 = vmatprep.mubr.msk.f32.mxu1 %vm153_vm1, %v639_v55 }
 0x3be   :  { %v1310_v56 = vpop.eup %1309 }
 0x3bf   :  { %v640_v57 = vmul.f32 %v1310_v56, %v1306_v38 }
 0x3c1   :  { %1257 = vmatmul.mubr.msk.f32.vlgmr.msra.gmra.mxu1 %vm153_vm1, %v640_v57 }
 0x3c2   :  { %1260 = vmatpush3.msra.mxu1 %v724_v45 }
 0x3c3   :  { %1261 = vmatprep.subr.mxu1 %v723_v58 }
 0x3c4   :  { %1262 = vmatpush3.msra.mxu1 %v723_v58 }
 0x3c5   :  { %1263 = vmatprep.subr.mxu1 %v722_v59 }
 0x3c6   :  { %v1312_v60 = vpop.eup %1311  ;;  %1264 = vmatpush3.msra.mxu1 %v722_v59 }
 0x3c7   :  { %1275 = vmatprep.subr.mxu1 %v1504_v11  ;;  %v907_v61 = vsel %vm153_vm1, %v1312_v60, 0.0 }
 0x3c8   :  { %908 = vadd.xlane.f32.xlu1 %v907_v61 }
 0x3ca   :  { %v1314_v62 = vpop.eup %1313 }
 0x3cb   :  { %v910_v63 = vsel %vm153_vm1, %v1314_v62, 0.0 }
 0x3cc   :  { %911 = vadd.xlane.f32.xlu1 %v910_v63 }
 0x451   :  { %v909_v0 = vpop.xlane.xlu1 %908 }
 0x452   :  { %1315 = vrcp.f32 %v909_v0 }
 0x455   :  { %v912_v1 = vpop.xlane.xlu1 %911 }
 0x456   :  { %1317 = vrcp.f32 %v912_v1 }
 0x45f   :  { %v1316_v2 = vpop.eup %1315 }
 0x460   :  { %v915_v6 = vmul.f32 %v1316_v2, %v1312_v60 }
 0x463   :  { %v1318_v5 = vpop.eup %1317 }
 0x464   :  { %v916_v7 = vmul.f32 %v1318_v5, %v1314_v62 }
 0x481   :  { %v1258_v3 = vpop.f32.mrf.mxu1 }
 0x483   :  { %v713_v4 = vpop.f32.mrf.mxu1 }
 0x484   :  { %1265 = vmatprep.mubr.msk.f32.mxu1 %vm527_vm2, %v713_v4 }
 0x485   :  { %1266 = vmatmul.mubr.msk.f32.vlgmr.msra.gmra.mxu1 %vm527_vm2, %v1258_v3 }
 0x486   :  { %1276 = vmatpush3.msra.mxu1 %v1504_v11  ;;  %1279 = vmatprep.mubr.msk.f32.mxu1 %vm153_vm1, %v915_v6 }
 0x487   :  { %1277 = vmatprep.subr.mxu1 %v1509_v14 }
 0x488   :  { %1278 = vmatpush3.msra.mxu1 %v1509_v14 }
 0x489   :  { %1280 = vmatmul.mubr.msk.f32.vlgmr.msra.gmra.mxu1 %vm153_vm1, %v916_v7  ;;  %1282 = vmatprep.subr.mxu1 %v1000_v8 }
 0x48a   :  { %1283 = vmatpush3.msra.mxu1 %v1000_v8 }
 0x48b   :  { %1284 = vmatprep.subr.mxu1 %v999_v9 }
 0x48c   :  { %1285 = vmatpush3.msra.mxu1 %v999_v9 }
 0x48d   :  { %1286 = vmatprep.subr.mxu1 %v998_v10 }
 0x48e   :  { %1287 = vmatpush3.msra.mxu1 %v998_v10 }
 0x545   :  { %v1267_v11 = vpop.f32.mrf.mxu1 }
 0x546   :  { %v807_v16 = vadd.f32 %v1267_v11, %v1129_v15 }
 0x547   :  { %v797_v12 = vpop.f32.mrf.mxu1 }
 0x548   :  { %v806_v18 = vadd.f32 %v1129_v15, %v797_v12 }
 0x549   :  { %v1281_v13 = vpop.f32.mrf.mxu1 }
 0x54b   :  { %v989_v14 = vpop.f32.mrf.mxu1 }
 0x54c   :  { %1288 = vmatprep.mubr.msk.f32.mxu1 %vm527_vm2, %v989_v14 }
 0x54d   :  { %1289 = vmatmul.mubr.msk.f32.vlgmr.msra.gmra.mxu1 %vm527_vm2, %v1281_v13 }
 0x60d   :  { %v1290_v17 = vpop.f32.mrf.mxu1 }
 0x60e   :  { %v1083_v19 = vadd.f32 %v1290_v17, %v807_v16 }
 0x60f   :  { %v1073_v20 = vpop.f32.mrf.mxu1 }
 0x610   :  { %1085 = vst.msk [vmem:[#allocation2 + $0x8] sm:$0xff] %vm48_vm0, %v1083_v19  ;;  %v1082_v21 = vadd.f32 %v1073_v20, %v806_v18 }
 0x612   :  { %1084 = vst.msk [vmem:[#allocation2] sm:$0xff] %vm48_vm0, %v1082_v21 }
 0x613   :  { %1330 = shalt.err (!%p1327_p4)
}
 0x614   :  { %s1343_s7 = smov 128   ;;  %s1344_s10 = smov 8  }
 0x615   :  { %1097 = dma.vmem_to_hbm [thread:$0]  %s1092_s9, 256, %s1591_s8, [#allocation3], %s1343_s7, %s1343_s7, %s1344_s10  }
 0x616   :  { %1339 = dma.done.wait [#allocation3], 256  }
 0x617   :  { %1340 = vsyncadd [#allocation3], 4294967040 }
 0x618   :  { %1101 = vsyncpa [#allocation3], 1 }

</bundles_post_ra>
